<compile_context>
chip_gen: v6e
topology: v6e:2x2x1
jax: 0.10.0
libtpu: 0.0.40
codegen_flags: <defaults>
</compile_context>

<pallas_src>
import functools

import jax
import jax.numpy as jnp
from jax.experimental import pallas as pl
from jax.experimental.pallas import tpu as pltpu


# ----------------------------- small JAX helpers -----------------------------

def rotvec2mat(rotvec):
    """Rodrigues formula: (..., 3) rotation vectors -> (..., 3, 3) matrices."""
    angle = jnp.linalg.norm(rotvec, axis=-1, keepdims=True)
    safe = jnp.maximum(angle, 1e-12)
    axis = rotvec / safe
    x, y, z = axis[..., 0], axis[..., 1], axis[..., 2]
    zero = jnp.zeros_like(x)
    K = jnp.stack(
        [
            jnp.stack([zero, -z, y], axis=-1),
            jnp.stack([z, zero, -x], axis=-1),
            jnp.stack([-y, x, zero], axis=-1),
        ],
        axis=-2,
    )
    s = jnp.sin(angle)[..., None]
    c = jnp.cos(angle)[..., None]
    eye = jnp.eye(3, dtype=rotvec.dtype)
    return eye + s * K + (1.0 - c) * (K @ K)


# ------------------------------- Pallas kernel --------------------------------

def _lbs_kernel(tv, bb, coef_ref, g_ref, dirs_ref, vt_ref, w_ref, out_ref):
    """Fused blendshapes + LBS for one (vertex tile, batch block).

    coef_ref: (1, bb*8, Kp)   bf16; per batch elem 8 identical rows
                              [betas | pose_feat | kid | 0-pad]
    g_ref:    (1, bb*32, J+1) f32; per batch elem rows 8c+C = R[:, C, c] over
                              joint lanes (lane J = 0), rows 24+C = joint
                              translations with the global trans in lane J.
    dirs_ref: (Kp, 3*tv)      bf16 slab [shapedirs; posedirs; kid_shapedir],
                              lane layout per tile = c*tv + v_local
    vt_ref:   (3, 3*tv)       f32 v_template (3 identical rows, same lane layout)
    w_ref:    (J+1, tv)       f32 skinning weights (joint-major) + all-ones row
    out_ref:  (bb, 3, tv)     f32 vertices (channel-first), trans already folded
    """
    # (bb*8, 3*tv): per batch elem rows identical; lane c*tv+v -> blendshape[v, c]
    vpf = jnp.dot(coef_ref[0], dirs_ref[...], preferred_element_type=jnp.float32)
    # (bb*32, tv): rv[b*32+8c+C, v] = sum_j R[j,C,c] w[v,j];
    #              rv[b*32+24+C, v] = sum_j t[j,C] w[v,j] + trans[C]
    rv = jnp.dot(g_ref[0], w_ref[...], preferred_element_type=jnp.float32)
    vt = vt_ref[...]                                          # (3, 3*tv) f32

    # NOTE: if tv is scaled up past ~1.5k lanes, chunk this epilogue over
    # 512-lane channel slices (inner unrolled fori_loop) to bound vreg/VMEM
    # pressure of vpf/rv.
    for b in range(bb):                    # bb <= 8, static unroll; all slices 8-aligned
        vp = vpf[b * 8:b * 8 + 3, :] + vt  # f32 v_posed, 3 identical rows
        r0 = b * 32
        out_ref[b, :, :] = (rv[r0 + 24:r0 + 27, :]
                            + rv[r0 + 0:r0 + 3, :] * vp[:, 0 * tv:1 * tv]
                            + rv[r0 + 8:r0 + 11, :] * vp[:, 1 * tv:2 * tv]
                            + rv[r0 + 16:r0 + 19, :] * vp[:, 2 * tv:3 * tv])


# ------------------------------ BodyModel (JAX) --------------------------------

class BodyModelPallas:
    """JAX/Pallas re-implementation of smplfitter's BodyModel.forward.

    Parameters are synthetic (deterministically initialized), matching the shapes
    the original module loads from disk.
    """

    def __init__(self, num_joints=24, num_vertices=384, num_betas=10, tile_v=None,
                 seed=42):
        self.num_joints = J = num_joints
        self.num_vertices = V = num_vertices
        self.num_betas = S = num_betas

        if tile_v is None:
            # Whole mesh in one lane-dense tile when small; at real SMPL sizes
            # (V=6890) this picks TV=1152 -> V_pad=6912, nvt=6 (>=2 tiles so
            # v7x megacore shards the vertex axis).  Re-check the (Kp, 3*TV)
            # bf16 block against VMEM on v7x (32 MiB default scoped / 64 MiB
            # physical) before raising TV further; set vmem_limit_bytes if so.
            v128 = -(-V // 128) * 128
            tile_v = v128 if v128 <= 2304 else 1152
        assert tile_v % 128 == 0
        self.tile_v = tile_v
        self.v_pad = Vp = -(-V // tile_v) * tile_v
        nvt = Vp // tile_v

        ks = jax.random.split(jax.random.PRNGKey(seed), 10)
        f32 = jnp.float32
        self.v_template = 0.5 * jax.random.normal(ks[0], (V, 3), f32)
        self.shapedirs = 0.1 * jax.random.normal(ks[1], (V, 3, S), f32)
        self.posedirs = 0.01 * jax.random.normal(ks[2], (V, 3, (J - 1) * 9), f32)
        self.J_regressor = jax.nn.softmax(                 # unused by forward()
            jax.random.normal(ks[3], (J, V), f32), axis=-1)
        self.J_template = 0.5 * jax.random.normal(ks[4], (J, 3), f32)
        self.J_shapedirs = 0.1 * jax.random.normal(ks[5], (J, 3, S), f32)
        self.kid_shapedir = 0.1 * jax.random.normal(ks[6], (V, 3), f32)
        self.kid_J_shapedir = 0.1 * jax.random.normal(ks[7], (J, 3), f32)
        self.weights = jax.nn.softmax(
            4.0 * jax.random.normal(ks[8], (V, J), f32), axis=-1)
        # simple valid kinematic tree: parent of joint i (>0) is (i-1)//2
        self.kintree_parents = [0] + [(i - 1) // 2 for i in range(1, J)]

        # ---------------- fused parameter slabs consumed by the kernel --------
        P = (J - 1) * 9
        K_raw = S + P + 1                        # [shapedirs | posedirs | kid]
        K_pad = -(-K_raw // 16) * 16             # bf16 sublane quantum
        self.num_dirs, self.num_dirs_pad = K_raw, K_pad

        dv = Vp - V
        shp = jnp.pad(self.shapedirs, ((0, dv), (0, 0), (0, 0)))
        psd = jnp.pad(self.posedirs, ((0, dv), (0, 0), (0, 0)))
        kid = jnp.pad(self.kid_shapedir, ((0, dv), (0, 0)))
        vtm = jnp.pad(self.v_template, ((0, dv), (0, 0)))
        wts = jnp.pad(self.weights, ((0, dv), (0, 0)))

        big = jnp.concatenate([shp, psd, kid[:, :, None]], axis=2)   # (Vp, 3, K_raw)
        kcv = jnp.transpose(big, (2, 1, 0))                          # (K_raw, 3, Vp)
        # per-tile channel-major lane layout: lane = tile*3*TV + c*TV + v_local
        slab = (kcv.reshape(K_raw, 3, nvt, tile_v)
                .transpose(0, 2, 1, 3)
                .reshape(K_raw, 3 * Vp))
        self.dirs_slab = jnp.pad(slab, ((0, K_pad - K_raw), (0, 0))
                                 ).astype(jnp.bfloat16)              # (Kp, 3Vp) bf16

        # v_template stays f32 (accuracy); 3 identical rows, same lane layout.
        vt_lane = (vtm.T.reshape(3, nvt, tile_v)
                   .transpose(1, 0, 2)
                   .reshape(1, 3 * Vp))
        self.vt_slab = jnp.asarray(
            jnp.broadcast_to(vt_lane, (3, 3 * Vp)), f32)             # (3, 3Vp) f32

        # skinning weights (joint-major) + all-ones row used to fold trans.
        # (Kept f32; bf16 here is a minor, optional traffic win.)
        self.w_slab = jnp.concatenate(
            [wts.T, jnp.ones((1, Vp), f32)], axis=0)                 # (J+1, Vp) f32

    # ------------------------------ vertex hot path ------------------------------
    def _lbs_pallas(self, betas_full, pose_feature, kid_b, glob_rotmats,
                    translations, trans_full):
        B = betas_full.shape[0]
        J = self.num_joints
        Vp = self.v_pad
        K_raw, K_pad = self.num_dirs, self.num_dirs_pad
        TV = self.tile_v
        nvt = Vp // TV

        BB = min(B, 8)                       # batch elements per kernel invocation
        n_bblk = -(-B // BB)
        B_pad = n_bblk * BB

        # coefficient row [betas | pose_feature | kid | 0-pad], replicated to
        # 8 MXU rows per batch element (free channel broadcast in the epilogue)
        coef = jnp.concatenate([betas_full, pose_feature, kid_b[:, None]], axis=1)
        coef = jnp.pad(coef, ((0, B_pad - B), (0, K_pad - K_raw)))
        coef8 = jnp.broadcast_to(coef.reshape(n_bblk, BB, 1, K_pad),
                                 (n_bblk, BB, 8, K_pad)
                                 ).reshape(n_bblk, BB * 8, K_pad).astype(jnp.bfloat16)

        # G: per batch elem rows 8c+C = R[:, C, c] over joints (lane J = 0);
        #    rows 24+C = joint translations with the GLOBAL trans in lane J
        #    (multiplied by the all-ones w row -> exact +trans fold).
        r_cf = jnp.transpose(glob_rotmats, (0, 3, 2, 1))                 # (B, c, C, J)
        r_cf = jnp.pad(r_cf, ((0, 0), (0, 0), (0, 5), (0, 1)))           # (B, 3, 8, J+1)
        t_cf = jnp.concatenate([jnp.transpose(translations, (0, 2, 1)),
                                trans_full[:, :, None]], axis=2)         # (B, 3, J+1)
        t_cf = jnp.pad(t_cf[:, None], ((0, 0), (0, 0), (0, 5), (0, 0)))  # (B, 1, 8, J+1)
        g_mat = jnp.concatenate([r_cf, t_cf], axis=1).reshape(B, 32, J + 1)
        g_mat = jnp.pad(g_mat, ((0, B_pad - B), (0, 0), (0, 0))
                        ).reshape(n_bblk, BB * 32, J + 1)

        out = pl.pallas_call(
            functools.partial(_lbs_kernel, TV, BB),
            out_shape=jax.ShapeDtypeStruct((B_pad, 3, Vp), jnp.float32),
            grid_spec=pltpu.PrefetchScalarGridSpec(
                num_scalar_prefetch=0,
                # batch-block axis is fastest-varying -> the big batch-invariant
                # slabs (dirs, vt, weights) keep the same block index across
                # consecutive steps and are not re-DMA'd per batch block.
                grid=(nvt, n_bblk),
                in_specs=[
                    pl.BlockSpec((1, BB * 8, K_pad), lambda i, b: (b, 0, 0)),
                    pl.BlockSpec((1, BB * 32, J + 1), lambda i, b: (b, 0, 0)),
                    pl.BlockSpec((K_pad, 3 * TV), lambda i, b: (0, i)),
                    pl.BlockSpec((3, 3 * TV), lambda i, b: (0, i)),
                    pl.BlockSpec((J + 1, TV), lambda i, b: (0, i)),
                ],
                out_specs=pl.BlockSpec((BB, 3, TV), lambda i, b: (b, 0, i)),
            ),
            compiler_params=pltpu.CompilerParams(
                # vertex-tile axis is the megacore-sharded one (v7x): the dirs
                # slab is then streamed exactly once chip-wide.
                dimension_semantics=("parallel", "arbitrary")),
        )(coef8, g_mat, self.dirs_slab, self.vt_slab, self.w_slab)
        return out  # (B_pad, 3, V_pad) channel-first, trans already applied

    # --------------------------------- forward ---------------------------------
    def forward(self, pose_rotvecs=None, shape_betas=None, trans=None,
                kid_factor=None, rel_rotmats=None, glob_rotmats=None,
                return_vertices=True, use_pallas=True):
        J, V, S = self.num_joints, self.num_vertices, self.num_betas
        batch_size = 0
        for arg in (pose_rotvecs, shape_betas, trans, rel_rotmats, glob_rotmats):
            if arg is not None:
                batch_size = arg.shape[0]
                break
        B = batch_size

        if rel_rotmats is not None:
            rel_rotmats = rel_rotmats.astype(jnp.float32)
        elif pose_rotvecs is not None:
            rel_rotmats = rotvec2mat(
                pose_rotvecs.astype(jnp.float32).reshape(B, J, 3))
        elif glob_rotmats is None:
            rel_rotmats = jnp.broadcast_to(jnp.eye(3, dtype=jnp.float32),
                                           (B, J, 3, 3))

        if glob_rotmats is None:
            glob = [rel_rotmats[:, 0]]
            for i_joint in range(1, J):
                glob.append(glob[self.kintree_parents[i_joint]] @ rel_rotmats[:, i_joint])
            glob_rotmats = jnp.stack(glob, axis=1)

        parent_idx = jnp.asarray(self.kintree_parents[1:], dtype=jnp.int32)
        parent_glob = jnp.concatenate(
            [jnp.broadcast_to(jnp.eye(3, dtype=jnp.float32), (B, 1, 3, 3)),
             glob_rotmats[:, parent_idx]], axis=1)
        if rel_rotmats is None:
            rel_rotmats = jnp.matmul(jnp.swapaxes(parent_glob, -1, -2), glob_rotmats)

        shape_betas = (shape_betas.astype(jnp.float32) if shape_betas is not None
                       else jnp.zeros((B, 0), jnp.float32))
        nb = min(shape_betas.shape[1], S)
        kid_factor = (jnp.zeros((1,), jnp.float32) if kid_factor is None
                      else jnp.asarray(kid_factor, jnp.float32))

        j = (self.J_template
             + jnp.einsum('jcs,bs->bjc', self.J_shapedirs[:, :, :nb], shape_betas[:, :nb])
             + jnp.einsum('jc,b->bjc', self.kid_J_shapedir, kid_factor))
        j_parent = jnp.concatenate(
            [jnp.zeros((j.shape[0], 1, 3), jnp.float32), j[:, parent_idx]], axis=1)
        bones = j - j_parent
        rotated_bones = jnp.einsum('bjCc,bjc->bjC', parent_glob, bones)
        pos = [j[:, 0]]
        for i_joint in range(1, J):
            pos.append(pos[self.kintree_parents[i_joint]] + rotated_bones[:, i_joint])
        glob_positions = jnp.stack(pos, axis=1)

        trans = (jnp.zeros((1, 3), jnp.float32) if trans is None
                 else trans.astype(jnp.float32))

        if not return_vertices:
            return dict(joints=glob_positions + trans[:, None],
                        orientations=glob_rotmats)

        pose_feature = rel_rotmats[:, 1:].reshape(B, (J - 1) * 9)
        translations = glob_positions - jnp.einsum('bjCc,bjc->bjC', glob_rotmats, j)

        # zero-pad betas to the full shapedirs width (equivalent to slicing dirs)
        betas_full = jnp.zeros((B, S), jnp.float32).at[:, :nb].set(shape_betas[:, :nb])
        kid_b = jnp.broadcast_to(kid_factor, (B,))
        trans_full = jnp.broadcast_to(trans, (B, 3))

        if use_pallas:
            v_cf = self._lbs_pallas(betas_full, pose_feature, kid_b,
                                    glob_rotmats, translations, trans_full)
            # trans is already folded into the kernel output; only the layout
            # change to the public (B, V, 3) API remains outside the kernel.
            vertices = jnp.transpose(v_cf[:B, :, :V], (0, 2, 1))
        else:  # pure-JAX reference path
            v_posed = (self.v_template
                       + jnp.einsum('vcp,bp->bvc', self.shapedirs, betas_full)
                       + jnp.einsum('vcp,bp->bvc', self.posedirs, pose_feature)
                       + jnp.einsum('vc,b->bvc', self.kid_shapedir, kid_b))
            vertices = (jnp.einsum('bjCc,vj,bvc->bvC', glob_rotmats, self.weights, v_posed)
                        + jnp.matmul(self.weights, translations)
                        + trans[:, None])

        return dict(joints=glob_positions + trans[:, None],
                    vertices=vertices,
                    orientations=glob_rotmats)


# ----------------------------------- main -------------------------------------

if __name__ == "__main__":
    B, J, V, S = 2, 24, 384, 10
    model = BodyModelPallas(num_joints=J, num_vertices=V, num_betas=S)

    k1, k2, k3, k4 = jax.random.split(jax.random.PRNGKey(0), 4)
    pose_rotvecs = 0.3 * jax.random.normal(k1, (B, J * 3), jnp.float32)
    shape_betas = jax.random.normal(k2, (B, S), jnp.float32)
    trans = 0.1 * jax.random.normal(k3, (B, 3), jnp.float32)
    kid_factor = 0.1 * jax.random.normal(k4, (B,), jnp.float32)

    out = model.forward(pose_rotvecs=pose_rotvecs, shape_betas=shape_betas,
                        trans=trans, kid_factor=kid_factor, return_vertices=True)
    jax.block_until_ready(out)

    ref = model.forward(pose_rotvecs=pose_rotvecs, shape_betas=shape_betas,
                        trans=trans, kid_factor=kid_factor, return_vertices=True,
                        use_pallas=False)
    jax.block_until_ready(ref)

    assert out["vertices"].shape == (B, V, 3)
    assert out["joints"].shape == (B, J, 3)
    assert out["orientations"].shape == (B, J, 3, 3)
    assert bool(jnp.all(jnp.isfinite(out["vertices"])))
    # shapedirs/posedirs/coefs are bf16, v_template & skinning stay f32 -> ~1e-3 level.
    assert bool(jnp.allclose(out["vertices"], ref["vertices"], atol=2e-2, rtol=2e-2))
    assert bool(jnp.allclose(out["joints"], ref["joints"], atol=1e-4, rtol=1e-4))

    print("KERNEL_OK")
</pallas_src>

<mosaic_0001>
module attributes {stable_mosaic.version = 11 : i64} {
  func.func @_lbs_kernel(%arg0: i32, %arg1: i32, %arg2: memref<1x16x224xbf16, #tpu.memory_space<vmem>>, %arg3: memref<1x64x25xf32, #tpu.memory_space<vmem>>, %arg4: memref<224x1152xbf16, #tpu.memory_space<vmem>>, %arg5: memref<3x1152xf32, #tpu.memory_space<vmem>>, %arg6: memref<25x384xf32, #tpu.memory_space<vmem>>, %arg7: memref<2x3x384xf32, #tpu.memory_space<vmem>>) attributes {dimension_semantics = [#tpu.dimension_semantics<parallel>, #tpu.dimension_semantics<arbitrary>], iteration_bounds = array<i64: 1, 1>, scalar_prefetch = 0 : i64, scratch_operands = 0 : i64, tpu.core_type = #tpu.core_type<tc>, window_params = [{transform_indices = @transform_0, window_bounds = array<i64: 1, 16, 224>}, {transform_indices = @transform_1, window_bounds = array<i64: 1, 64, 25>}, {transform_indices = @transform_2, window_bounds = array<i64: 224, 1152>}, {transform_indices = @transform_3, window_bounds = array<i64: 3, 1152>}, {transform_indices = @transform_4, window_bounds = array<i64: 25, 384>}, {transform_indices = @transform_5, window_bounds = array<i64: 2, 3, 384>}]} {
    %c0 = arith.constant 0 : index
    %c0_0 = arith.constant 0 : index
    %c0_1 = arith.constant 0 : index
    %0 = vector.load %arg2[%c0, %c0_0, %c0_1] : memref<1x16x224xbf16, #tpu.memory_space<vmem>>, vector<1x16x224xbf16>
    %1 = vector.shape_cast %0 : vector<1x16x224xbf16> to vector<16x224xbf16>
    %c0_2 = arith.constant 0 : index
    %c0_3 = arith.constant 0 : index
    %2 = vector.load %arg4[%c0_2, %c0_3] : memref<224x1152xbf16, #tpu.memory_space<vmem>>, vector<224x1152xbf16>
    %cst = arith.constant dense<0.000000e+00> : vector<16x1152xf32>
    %3 = tpu.matmul %1, %2, %cst {dimension_numbers = #tpu.dot_dimension_numbers<[1], [0], [0], [1], [0, 0, 1, 1], [], []>} : vector<16x224xbf16>, vector<224x1152xbf16>, vector<16x1152xf32> -> vector<16x1152xf32>
    %c0_4 = arith.constant 0 : index
    %c0_5 = arith.constant 0 : index
    %c0_6 = arith.constant 0 : index
    %4 = vector.load %arg3[%c0_4, %c0_5, %c0_6] : memref<1x64x25xf32, #tpu.memory_space<vmem>>, vector<1x64x25xf32>
    %5 = vector.shape_cast %4 : vector<1x64x25xf32> to vector<64x25xf32>
    %c0_7 = arith.constant 0 : index
    %c0_8 = arith.constant 0 : index
    %6 = vector.load %arg6[%c0_7, %c0_8] : memref<25x384xf32, #tpu.memory_space<vmem>>, vector<25x384xf32>
    %cst_9 = arith.constant dense<0.000000e+00> : vector<64x384xf32>
    %7 = tpu.matmul %5, %6, %cst_9 {dimension_numbers = #tpu.dot_dimension_numbers<[1], [0], [0], [1], [0, 0, 1, 1], [], []>} : vector<64x25xf32>, vector<25x384xf32>, vector<64x384xf32> -> vector<64x384xf32>
    %c0_10 = arith.constant 0 : index
    %c0_11 = arith.constant 0 : index
    %8 = vector.load %arg5[%c0_10, %c0_11] : memref<3x1152xf32, #tpu.memory_space<vmem>>, vector<3x1152xf32>
    %9 = vector.extract_strided_slice %3 {offsets = [0, 0], sizes = [3, 1152], strides = [1, 1]} : vector<16x1152xf32> to vector<3x1152xf32>
    %10 = arith.addf %9, %8 : vector<3x1152xf32>
    %11 = vector.extract_strided_slice %7 {offsets = [24, 0], sizes = [3, 384], strides = [1, 1]} : vector<64x384xf32> to vector<3x384xf32>
    %12 = vector.extract_strided_slice %7 {offsets = [0, 0], sizes = [3, 384], strides = [1, 1]} : vector<64x384xf32> to vector<3x384xf32>
    %13 = vector.extract_strided_slice %10 {offsets = [0, 0], sizes = [3, 384], strides = [1, 1]} : vector<3x1152xf32> to vector<3x384xf32>
    %14 = arith.mulf %12, %13 : vector<3x384xf32>
    %15 = arith.addf %11, %14 : vector<3x384xf32>
    %16 = vector.extract_strided_slice %7 {offsets = [8, 0], sizes = [3, 384], strides = [1, 1]} : vector<64x384xf32> to vector<3x384xf32>
    %17 = vector.extract_strided_slice %10 {offsets = [0, 384], sizes = [3, 384], strides = [1, 1]} : vector<3x1152xf32> to vector<3x384xf32>
    %18 = arith.mulf %16, %17 : vector<3x384xf32>
    %19 = arith.addf %15, %18 : vector<3x384xf32>
    %20 = vector.extract_strided_slice %7 {offsets = [16, 0], sizes = [3, 384], strides = [1, 1]} : vector<64x384xf32> to vector<3x384xf32>
    %21 = vector.extract_strided_slice %10 {offsets = [0, 768], sizes = [3, 384], strides = [1, 1]} : vector<3x1152xf32> to vector<3x384xf32>
    %22 = arith.mulf %20, %21 : vector<3x384xf32>
    %23 = arith.addf %19, %22 : vector<3x384xf32>
    %c0_12 = arith.constant 0 : index
    %c0_13 = arith.constant 0 : index
    %c0_14 = arith.constant 0 : index
    %24 = vector.load %arg7[%c0_12, %c0_13, %c0_14] : memref<2x3x384xf32, #tpu.memory_space<vmem>>, vector<1x3x384xf32>
    %25 = vector.shape_cast %24 : vector<1x3x384xf32> to vector<3x384xf32>
    %26 = vector.shape_cast %23 : vector<3x384xf32> to vector<1x3x384xf32>
    tpu.vector_store %arg7[%c0_12, %c0_13, %c0_14], %26 {strides = array<i32>} : memref<2x3x384xf32, #tpu.memory_space<vmem>>, vector<1x3x384xf32>,
    %27 = vector.extract_strided_slice %3 {offsets = [8, 0], sizes = [3, 1152], strides = [1, 1]} : vector<16x1152xf32> to vector<3x1152xf32>
    %28 = arith.addf %27, %8 : vector<3x1152xf32>
    %29 = vector.extract_strided_slice %7 {offsets = [56, 0], sizes = [3, 384], strides = [1, 1]} : vector<64x384xf32> to vector<3x384xf32>
    %30 = vector.extract_strided_slice %7 {offsets = [32, 0], sizes = [3, 384], strides = [1, 1]} : vector<64x384xf32> to vector<3x384xf32>
    %31 = vector.extract_strided_slice %28 {offsets = [0, 0], sizes = [3, 384], strides = [1, 1]} : vector<3x1152xf32> to vector<3x384xf32>
    %32 = arith.mulf %30, %31 : vector<3x384xf32>
    %33 = arith.addf %29, %32 : vector<3x384xf32>
    %34 = vector.extract_strided_slice %7 {offsets = [40, 0], sizes = [3, 384], strides = [1, 1]} : vector<64x384xf32> to vector<3x384xf32>
    %35 = vector.extract_strided_slice %28 {offsets = [0, 384], sizes = [3, 384], strides = [1, 1]} : vector<3x1152xf32> to vector<3x384xf32>
    %36 = arith.mulf %34, %35 : vector<3x384xf32>
    %37 = arith.addf %33, %36 : vector<3x384xf32>
    %38 = vector.extract_strided_slice %7 {offsets = [48, 0], sizes = [3, 384], strides = [1, 1]} : vector<64x384xf32> to vector<3x384xf32>
    %39 = vector.extract_strided_slice %28 {offsets = [0, 768], sizes = [3, 384], strides = [1, 1]} : vector<3x1152xf32> to vector<3x384xf32>
    %40 = arith.mulf %38, %39 : vector<3x384xf32>
    %41 = arith.addf %37, %40 : vector<3x384xf32>
    %c1 = arith.constant 1 : index
    %c0_15 = arith.constant 0 : index
    %c0_16 = arith.constant 0 : index
    %42 = vector.load %arg7[%c1, %c0_15, %c0_16] : memref<2x3x384xf32, #tpu.memory_space<vmem>>, vector<1x3x384xf32>
    %43 = vector.shape_cast %42 : vector<1x3x384xf32> to vector<3x384xf32>
    %44 = vector.shape_cast %41 : vector<3x384xf32> to vector<1x3x384xf32>
    tpu.vector_store %arg7[%c1, %c0_15, %c0_16], %44 {strides = array<i32>} : memref<2x3x384xf32, #tpu.memory_space<vmem>>, vector<1x3x384xf32>,
    return
  }
  func.func @transform_0(%arg0: i32, %arg1: i32) -> (i32, i32, i32) {
    %c0_i32 = arith.constant 0 : i32
    %c0_i32_0 = arith.constant 0 : i32
    %c0_i32_1 = arith.constant 0 : i32
    return %arg1, %c0_i32, %c0_i32_0 : i32, i32, i32
  }
  func.func @transform_1(%arg0: i32, %arg1: i32) -> (i32, i32, i32) {
    %c0_i32 = arith.constant 0 : i32
    %c0_i32_0 = arith.constant 0 : i32
    %c0_i32_1 = arith.constant 0 : i32
    return %arg1, %c0_i32, %c0_i32_0 : i32, i32, i32
  }
  func.func @transform_2(%arg0: i32, %arg1: i32) -> (i32, i32) {
    %c0_i32 = arith.constant 0 : i32
    %c0_i32_0 = arith.constant 0 : i32
    return %c0_i32, %arg0 : i32, i32
  }
  func.func @transform_3(%arg0: i32, %arg1: i32) -> (i32, i32) {
    %c0_i32 = arith.constant 0 : i32
    %c0_i32_0 = arith.constant 0 : i32
    return %c0_i32, %arg0 : i32, i32
  }
  func.func @transform_4(%arg0: i32, %arg1: i32) -> (i32, i32) {
    %c0_i32 = arith.constant 0 : i32
    %c0_i32_0 = arith.constant 0 : i32
    return %c0_i32, %arg0 : i32, i32
  }
  func.func @transform_5(%arg0: i32, %arg1: i32) -> (i32, i32, i32) {
    %c0_i32 = arith.constant 0 : i32
    %c0_i32_0 = arith.constant 0 : i32
    return %arg1, %c0_i32, %arg0 : i32, i32, i32
  }
}

</mosaic_0001>

<bundles_post_ra>
// kernel: tpu_custom_call.1
= control target key start
LH: loop header
LB: loop body
LE: loop exit
PB: predicated region body
PF: predicated region fallthrough
CT: control target
= control target key end

     0   :  { %10 = vsyncpa [#allocation3], 0  ;;  %s2068_s0 = inlined_call_operand.hbm [shape: bf16[1,16,224], index: 0, kind: input, shape index: {}]   ;;  %s2069_s1 = inlined_call_operand.vmem [shape: f32[1,64,25], index: 1, kind: input, shape index: {}]   ;;  %s2070_s2 = inlined_call_operand.hbm [shape: bf16[224,1152], index: 2, kind: input, shape index: {}]   ;;  %s2071_s3 = inlined_call_operand.hbm [shape: f32[3,1152], index: 3, kind: input, shape index: {}]   ;;  %s2072_s4 = inlined_call_operand.vmem [shape: f32[25,384], index: 4, kind: input, shape index: {}]   ;;  %s2073_s5 = inlined_call_operand.vmem [shape: f32[2,3,384], index: 5, kind: output, shape index: {}]  }
   0x1   :  { %11 = vsyncpa [#allocation5], 0  ;;  %s1883_s18 = smov [#allocation4]  }
   0x2   :  { %s31_s19 = sshll.u32 %s1883_s18, 4  ;;  %s32_s19 = int_to_ptr.vmem [resolvable:$true] %s31_s19 }
   0x3   :  { %s1827_s20 = scalar_lea.vmem %s32_s19, 16128  ;;  %p1832_p1 = scmp.lt.s32.totalorder %s32_s19, %s32_s19 }
   0x4   :  { %p1828_p0 = scmp.ne.s32.totalorder %s32_s19, %s1827_s20  ;;  %p1833_p2 = scmp.lt.s32.totalorder %s1827_s20, %s1827_s20 }
   0x6   :  { %p1834_p3 = por %p1833_p2, %p1832_p1 }
   0x8   :  { %p1835_p4 = pnand %p1834_p3, %p1828_p0 }
   0xa   :  { %1838 = shalt.err (!%p1835_p4)
}
   0xb   :  { %s1884_s21 = smov 576   ;;  %s1885_s22 = smov 36  }
   0xc   :  { %37 = dma.hbm_to_vmem [thread:$0]  %s2070_s2, 16128, %s32_s19, [#allocation5], %s1884_s21, %s1884_s21, %s1885_s22  }
   0xd   :  { %s1886_s25 = smov [#allocation2]  }
   0xe   :  { %s17_s26 = sshll.u32 %s1886_s25, 4  ;;  %s18_s26 = int_to_ptr.vmem [resolvable:$true] %s17_s26 }
   0xf   :  { %s1847_s27 = scalar_lea.vmem %s18_s26, 256  ;;  %p1852_p6 = scmp.lt.s32.totalorder %s18_s26, %s18_s26 }
  0x10   :  { %p1848_p5 = scmp.ne.s32.totalorder %s18_s26, %s1847_s27  ;;  %p1853_p7 = scmp.lt.s32.totalorder %s1847_s27, %s1847_s27 }
  0x12   :  { %p1854_p8 = por %p1853_p7, %p1852_p6 }
  0x14   :  { %p1855_p9 = pnand %p1854_p8, %p1848_p5 }
  0x16   :  { %1858 = shalt.err (!%p1855_p9)
}
  0x17   :  { %s1887_s28 = smov 128   ;;  %s1888_s29 = smov 8  }
  0x18   :  { %23 = dma.hbm_to_vmem [thread:$0]  %s2068_s0, 256, %s18_s26, [#allocation3], %s1887_s28, %s1887_s28, %s1888_s29  }
  0x19   :  { %s1889_s7 = smov [#allocation6]  }
  0x1a   :  { %s44_s8 = sshll.u32 %s1889_s7, 4  ;;  %s45_s8 = int_to_ptr.vmem [resolvable:$true] %s44_s8 }
  0x1b   :  { %s1867_s2 = scalar_lea.vmem %s45_s8, 576  ;;  %p1872_p11 = scmp.lt.s32.totalorder %s45_s8, %s45_s8 }
  0x1c   :  { %p1868_p10 = scmp.ne.s32.totalorder %s45_s8, %s1867_s2  ;;  %p1873_p12 = scmp.lt.s32.totalorder %s1867_s2, %s1867_s2 }
  0x1e   :  { %p1874_p13 = por %p1873_p12, %p1872_p11 }
  0x20   :  { %p1875_p0 = pnand %p1874_p13, %p1868_p10 }
  0x22   :  { %1878 = shalt.err (!%p1875_p0)
}
  0x23   :  { %47 = dma.hbm_to_vmem [thread:$0]  %s2071_s3, 576, %s45_s8, [#allocation5]  }
  0x24   :  { %1879 = dma.done.wait [#allocation3], 256  }
  0x25   :  { %1880 = vsyncadd [#allocation3], 4294967040 }
  0x26   :  { %1881 = dma.done.wait [#allocation5], 16704  }
  0x27   :  { %1882 = vsyncadd [#allocation5], 4294950592  ;;  %v1630_v0 = vld [vmem:[#allocation4 + $0x1fc] ss:$36 sps:$4 sm:$0xff]   ;;  %v1632_v1 = vld [vmem:[#allocation4 + $0x204] ss:$36 sps:$4 sm:$0xff]  }
  0x28   :  { %859 = vmatprep.subr.bf16.mxu0 %v1630_v0  ;;  %v1634_v2 = vld [vmem:[#allocation4 + $0x1f8] ss:$36 sps:$4 sm:$0xff]   ;;  %v1635_v3 = vld [vmem:[#allocation4 + $0x200] ss:$36 sps:$4 sm:$0xff]   ;;  %902 = vmatprep.subr.bf16.mxu1 %v1632_v1  ;;  %v1640_v6 = vld [vmem:[#allocation4 + $0x1b0] ss:$36 sps:$4 sm:$0xff]  }
  0x29   :  { %v1636_v4 = vld [vmem:[#allocation4 + $0x1b4] ss:$36 sps:$4 sm:$0xff]   ;;  %860 = vmatpush1.bf16.msra.mxu0 %v1634_v2  ;;  %903 = vmatpush1.bf16.msra.mxu1 %v1635_v3  ;;  %v1638_v5 = vld [vmem:[#allocation4 + $0x1bc] ss:$36 sps:$4 sm:$0xff]   ;;  %v1642_v8 = vld [vmem:[#allocation4 + $0x16c] ss:$36 sps:$4 sm:$0xff]  }
  0x2a   :  { %861 = vmatprep.subr.bf16.mxu0 %v1636_v4  ;;  %v1641_v7 = vld [vmem:[#allocation4 + $0x1b8] ss:$36 sps:$4 sm:$0xff]   ;;  %904 = vmatprep.subr.bf16.mxu1 %v1638_v5  ;;  %v1646_v10 = vld [vmem:[#allocation4 + $0x168] ss:$36 sps:$4 sm:$0xff]   ;;  %v1647_v11 = vld [vmem:[#allocation4 + $0x170] ss:$36 sps:$4 sm:$0xff]  }
  0x2b   :  { %v1644_v9 = vld [vmem:[#allocation4 + $0x174] ss:$36 sps:$4 sm:$0xff]   ;;  %v1648_v12 = vld [vmem:[#allocation4 + $0x124] ss:$36 sps:$4 sm:$0xff]   ;;  %v1650_v13 = vld [vmem:[#allocation4 + $0x12c] ss:$36 sps:$4 sm:$0xff]  }
  0x2c   :  { %v1652_v14 = vld [vmem:[#allocation4 + $0x120] ss:$36 sps:$4 sm:$0xff]   ;;  %v1653_v15 = vld [vmem:[#allocation4 + $0x128] ss:$36 sps:$4 sm:$0xff]   ;;  %v1658_v18 = vld [vmem:[#allocation4 + $0xd8] ss:$36 sps:$4 sm:$0xff]  }
  0x2d   :  { %862 = vmatpush1.bf16.msra.mxu0 %v1640_v6  ;;  %905 = vmatpush1.bf16.msra.mxu1 %v1641_v7  ;;  %v1654_v16 = vld [vmem:[#allocation4 + $0xdc] ss:$36 sps:$4 sm:$0xff]   ;;  %v1656_v17 = vld [vmem:[#allocation4 + $0xe4] ss:$36 sps:$4 sm:$0xff]   ;;  %v1660_v20 = vld [vmem:[#allocation4 + $0x94] ss:$36 sps:$4 sm:$0xff]  }
  0x2e   :  { %863 = vmatprep.subr.bf16.mxu0 %v1642_v8  ;;  %906 = vmatprep.subr.bf16.mxu1 %v1644_v9  ;;  %v1659_v19 = vld [vmem:[#allocation4 + $0xe0] ss:$36 sps:$4 sm:$0xff]   ;;  %v1664_v22 = vld [vmem:[#allocation4 + $0x90] ss:$36 sps:$4 sm:$0xff]   ;;  %v1665_v23 = vld [vmem:[#allocation4 + $0x98] ss:$36 sps:$4 sm:$0xff]  }
  0x2f   :  { %v1662_v21 = vld [vmem:[#allocation4 + $0x9c] ss:$36 sps:$4 sm:$0xff]   ;;  %v1666_v24 = vld [vmem:[#allocation4 + $0x4c] ss:$36 sps:$4 sm:$0xff]   ;;  %v1668_v25 = vld [vmem:[#allocation4 + $0x54] ss:$36 sps:$4 sm:$0xff]  }
  0x30   :  { %v1670_v26 = vld [vmem:[#allocation4 + $0x48] ss:$36 sps:$4 sm:$0xff]   ;;  %v1671_v27 = vld [vmem:[#allocation4 + $0x50] ss:$36 sps:$4 sm:$0xff]   ;;  %v1676_v30 = vld [vmem:[#allocation4] ss:$36 sps:$4 sm:$0xff]  }
  0x31   :  { %864 = vmatpush1.bf16.msra.mxu0 %v1646_v10  ;;  %907 = vmatpush1.bf16.msra.mxu1 %v1647_v11  ;;  %v1672_v28 = vld [vmem:[#allocation4 + $0x4] ss:$36 sps:$4 sm:$0xff]   ;;  %v1674_v29 = vld [vmem:[#allocation4 + $0xc] ss:$36 sps:$4 sm:$0xff]   ;;  %v1680_v33 = vld [vmem:[#allocation4 + $0x3b4] ss:$36 sps:$4 sm:$0xff]  }
  0x32   :  { %865 = vmatprep.subr.bf16.mxu0 %v1648_v12  ;;  %908 = vmatprep.subr.bf16.mxu1 %v1650_v13  ;;  %v1677_v31 = vld [vmem:[#allocation4 + $0x8] ss:$36 sps:$4 sm:$0xff]   ;;  %v1683_v35 = vld [vmem:[#allocation4 + $0x3b0] ss:$36 sps:$4 sm:$0xff]   ;;  %v1688_v38 = vld [vmem:[#allocation4 + $0x360] ss:$36 sps:$4 sm:$0xff]  }
  0x33   :  { %v1678_v32 = vld [vmem:[#allocation4 + $0x3ac] ss:$36 sps:$4 sm:$0xff]   ;;  %v1684_v36 = vld [vmem:[#allocation4 + $0x364] ss:$36 sps:$4 sm:$0xff]   ;;  %v1690_v40 = vld [vmem:[#allocation4 + $0x31c] ss:$36 sps:$4 sm:$0xff]  }
  0x34   :  { %v1682_v34 = vld [vmem:[#allocation4 + $0x3a8] ss:$36 sps:$4 sm:$0xff]   ;;  %v1931_v42 = vld [vmem:[#allocation2 + $0x4] ss:$8 sps:$4 sm:$0xff]   ;;  %v1695_v44 = vld [vmem:[#allocation4 + $0x320] ss:$36 sps:$4 sm:$0xff]  }
  0x35   :  { %866 = vmatpush1.bf16.msra.mxu0 %v1652_v14  ;;  %909 = vmatpush1.bf16.msra.mxu1 %v1653_v15  ;;  %v1686_v37 = vld [vmem:[#allocation4 + $0x36c] ss:$36 sps:$4 sm:$0xff]   ;;  %v1692_v41 = vld [vmem:[#allocation4 + $0x324] ss:$36 sps:$4 sm:$0xff]   ;;  %v1694_v43 = vld [vmem:[#allocation4 + $0x318] ss:$36 sps:$4 sm:$0xff]  }
  0x36   :  { %867 = vmatprep.subr.bf16.mxu0 %v1654_v16  ;;  %910 = vmatprep.subr.bf16.mxu1 %v1656_v17  ;;  %v1689_v39 = vld [vmem:[#allocation4 + $0x368] ss:$36 sps:$4 sm:$0xff]   ;;  %vm855_vm0 = vcmask 785408   ;;  %v1696_v45 = vld [vmem:[#allocation4 + $0x2d4] ss:$36 sps:$4 sm:$0xff]   ;;  %vm1117_vm1 = vcmask 1040384  }
  0x37   :  { %v1698_v46 = vld [vmem:[#allocation4 + $0x2dc] ss:$36 sps:$4 sm:$0xff]   ;;  %1563 = vmatprep.mubr.msk.bf16.mxu0 %vm855_vm0, %v1931_v42  ;;  %1564 = vmatprep.mubr.msk.bf16.mxu1 %vm855_vm0, %v1931_v42  ;;  %v1700_v47 = vld [vmem:[#allocation4 + $0x2d0] ss:$36 sps:$4 sm:$0xff]   ;;  %v1706_v51 = vld [vmem:[#allocation4 + $0x288] ss:$36 sps:$4 sm:$0xff]  }
  0x38   :  { %v1701_v48 = vld [vmem:[#allocation4 + $0x2d8] ss:$36 sps:$4 sm:$0xff]   ;;  %v1702_v49 = vld [vmem:[#allocation4 + $0x28c] ss:$36 sps:$4 sm:$0xff]   ;;  %v1708_v53 = vld [vmem:[#allocation4 + $0x244] ss:$36 sps:$4 sm:$0xff]  }
  0x39   :  { %868 = vmatpush1.bf16.msra.mxu0 %v1658_v18  ;;  %911 = vmatpush1.bf16.msra.mxu1 %v1659_v19  ;;  %v1704_v50 = vld [vmem:[#allocation4 + $0x294] ss:$36 sps:$4 sm:$0xff]   ;;  %v1710_v54 = vld [vmem:[#allocation4 + $0x24c] ss:$36 sps:$4 sm:$0xff]   ;;  %v1712_v55 = vld [vmem:[#allocation4 + $0x240] ss:$36 sps:$4 sm:$0xff]  }
  0x3a   :  { %869 = vmatprep.subr.bf16.mxu0 %v1660_v20  ;;  %912 = vmatprep.subr.bf16.mxu1 %v1662_v21  ;;  %v1707_v52 = vld [vmem:[#allocation4 + $0x290] ss:$36 sps:$4 sm:$0xff]   ;;  %v1713_v56 = vld [vmem:[#allocation4 + $0x248] ss:$36 sps:$4 sm:$0xff]   ;;  %v1723_v0 = vld [vmem:[#allocation4 + $0x1c0] ss:$36 sps:$4 sm:$0xff]  }
  0x3b   :  { %v1719_v57 = vld [vmem:[#allocation4 + $0x20c] ss:$36 sps:$4 sm:$0xff]   ;;  %v1722_v58 = vld [vmem:[#allocation4 + $0x214] ss:$36 sps:$4 sm:$0xff]   ;;  %v1725_v62 = vld [vmem:[#allocation4 + $0x1c4] ss:$36 sps:$4 sm:$0xff]  }
  0x3c   :  { %v1937_v59 = vld [vmem:[#allocation2] ss:$8 sps:$4 sm:$0xff]   ;;  %v1717_v60 = vld [vmem:[#allocation4 + $0x208] ss:$36 sps:$4 sm:$0xff]   ;;  %v1731_v2 = vld [vmem:[#allocation4 + $0x17c] ss:$36 sps:$4 sm:$0xff]  }
  0x3d   :  { %870 = vmatpush1.bf16.msra.mxu0 %v1664_v22  ;;  %913 = vmatpush1.bf16.msra.mxu1 %v1665_v23  ;;  %v1720_v61 = vld [vmem:[#allocation4 + $0x210] ss:$36 sps:$4 sm:$0xff]   ;;  %v1726_v1 = vld [vmem:[#allocation4 + $0x1c8] ss:$36 sps:$4 sm:$0xff]   ;;  %v1729_v4 = vld [vmem:[#allocation4 + $0x178] ss:$36 sps:$4 sm:$0xff]  }
  0x3e   :  { %871 = vmatprep.subr.bf16.mxu0 %v1666_v24  ;;  %914 = vmatprep.subr.bf16.mxu1 %v1668_v25  ;;  %v1728_v63 = vld [vmem:[#allocation4 + $0x1cc] ss:$36 sps:$4 sm:$0xff]   ;;  %v1734_v3 = vld [vmem:[#allocation4 + $0x184] ss:$36 sps:$4 sm:$0xff]   ;;  %v1737_v6 = vld [vmem:[#allocation4 + $0x134] ss:$36 sps:$4 sm:$0xff]  }
  0x3f   :  { %v1732_v5 = vld [vmem:[#allocation4 + $0x180] ss:$36 sps:$4 sm:$0xff]   ;;  %v1735_v8 = vld [vmem:[#allocation4 + $0x130] ss:$36 sps:$4 sm:$0xff]   ;;  %v1738_v9 = vld [vmem:[#allocation4 + $0x138] ss:$36 sps:$4 sm:$0xff]  }
  0x40   :  { %v1740_v7 = vld [vmem:[#allocation4 + $0x13c] ss:$36 sps:$4 sm:$0xff]   ;;  %v1743_v10 = vld [vmem:[#allocation4 + $0xec] ss:$36 sps:$4 sm:$0xff]   ;;  %v1746_v11 = vld [vmem:[#allocation4 + $0xf4] ss:$36 sps:$4 sm:$0xff]  }
  0x41   :  { %872 = vmatpush1.bf16.msra.mxu0 %v1670_v26  ;;  %915 = vmatpush1.bf16.msra.mxu1 %v1671_v27  ;;  %v1741_v12 = vld [vmem:[#allocation4 + $0xe8] ss:$36 sps:$4 sm:$0xff]   ;;  %v1744_v13 = vld [vmem:[#allocation4 + $0xf0] ss:$36 sps:$4 sm:$0xff]   ;;  %v1747_v16 = vld [vmem:[#allocation4 + $0xa0] ss:$36 sps:$4 sm:$0xff]  }
  0x42   :  { %873 = vmatprep.subr.bf16.mxu0 %v1672_v28  ;;  %916 = vmatprep.subr.bf16.mxu1 %v1674_v29  ;;  %v1749_v14 = vld [vmem:[#allocation4 + $0xa4] ss:$36 sps:$4 sm:$0xff]   ;;  %v1752_v15 = vld [vmem:[#allocation4 + $0xac] ss:$36 sps:$4 sm:$0xff]   ;;  %v1755_v18 = vld [vmem:[#allocation4 + $0x5c] ss:$36 sps:$4 sm:$0xff]  }
  0x43   :  { %v1750_v17 = vld [vmem:[#allocation4 + $0xa8] ss:$36 sps:$4 sm:$0xff]   ;;  %v1753_v20 = vld [vmem:[#allocation4 + $0x58] ss:$36 sps:$4 sm:$0xff]   ;;  %v1756_v21 = vld [vmem:[#allocation4 + $0x60] ss:$36 sps:$4 sm:$0xff]  }
  0x44   :  { %v1758_v19 = vld [vmem:[#allocation4 + $0x64] ss:$36 sps:$4 sm:$0xff]   ;;  %v1761_v22 = vld [vmem:[#allocation4 + $0x14] ss:$36 sps:$4 sm:$0xff]   ;;  %v1764_v23 = vld [vmem:[#allocation4 + $0x1c] ss:$36 sps:$4 sm:$0xff]  }
  0x45   :  { %874 = vmatpush1.bf16.msra.mxu0 %v1676_v30  ;;  %917 = vmatpush1.bf16.msra.mxu1 %v1677_v31  ;;  %v1759_v24 = vld [vmem:[#allocation4 + $0x10] ss:$36 sps:$4 sm:$0xff]   ;;  %v1762_v25 = vld [vmem:[#allocation4 + $0x18] ss:$36 sps:$4 sm:$0xff]   ;;  %v1770_v27 = vld [vmem:[#allocation4 + $0x3c4] ss:$36 sps:$4 sm:$0xff]  }
  0x46   :  { %879 = vmatprep.subr.bf16.mxu0 %v1678_v32  ;;  %922 = vmatprep.subr.bf16.mxu1 %v1680_v33  ;;  %v1767_v26 = vld [vmem:[#allocation4 + $0x3bc] ss:$36 sps:$4 sm:$0xff]   ;;  %v1773_v30 = vld [vmem:[#allocation4 + $0x374] ss:$36 sps:$4 sm:$0xff]   ;;  %vm1092_vm2 = vcmask 203776  }
  0x47   :  { %v1765_v28 = vld [vmem:[#allocation4 + $0x3b8] ss:$36 sps:$4 sm:$0xff]   ;;  %v1768_v29 = vld [vmem:[#allocation4 + $0x3c0] ss:$36 sps:$4 sm:$0xff]   ;;  %v1771_v32 = vld [vmem:[#allocation4 + $0x370] ss:$36 sps:$4 sm:$0xff]  }
  0x48   :  { %v1776_v31 = vld [vmem:[#allocation4 + $0x37c] ss:$36 sps:$4 sm:$0xff]  }
  0x49   :  { %880 = vmatpush2.bf16.msra.mxu0 %v1682_v34  ;;  %923 = vmatpush2.bf16.msra.mxu1 %v1683_v35  ;;  %v1774_v33 = vld [vmem:[#allocation4 + $0x378] ss:$36 sps:$4 sm:$0xff]   ;;  %v1779_v34 = vld [vmem:[#allocation4 + $0x32c] ss:$36 sps:$4 sm:$0xff]  }
  0x4a   :  { %881 = vmatprep.subr.bf16.mxu0 %v1684_v36  ;;  %924 = vmatprep.subr.bf16.mxu1 %v1686_v37  ;;  %v1782_v35 = vld [vmem:[#allocation4 + $0x334] ss:$36 sps:$4 sm:$0xff]   ;;  %v1777_v36 = vld [vmem:[#allocation4 + $0x328] ss:$36 sps:$4 sm:$0xff]  }
  0x4b   :  { %v1780_v37 = vld [vmem:[#allocation4 + $0x330] ss:$36 sps:$4 sm:$0xff]  }
  0x4d   :  { %882 = vmatpush2.bf16.msra.mxu0 %v1688_v38  ;;  %925 = vmatpush2.bf16.msra.mxu1 %v1689_v39  ;;  %v1785_v38 = vld [vmem:[#allocation4 + $0x2e4] ss:$36 sps:$4 sm:$0xff]   ;;  %v1788_v39 = vld [vmem:[#allocation4 + $0x2ec] ss:$36 sps:$4 sm:$0xff]  }
  0x4e   :  { %883 = vmatprep.subr.bf16.mxu0 %v1690_v40  ;;  %926 = vmatprep.subr.bf16.mxu1 %v1692_v41  ;;  %v1783_v40 = vld [vmem:[#allocation4 + $0x2e0] ss:$36 sps:$4 sm:$0xff]   ;;  %v1786_v41 = vld [vmem:[#allocation4 + $0x2e8] ss:$36 sps:$4 sm:$0xff]  }
  0x51   :  { %884 = vmatpush2.bf16.msra.mxu0 %v1694_v43  ;;  %927 = vmatpush2.bf16.msra.mxu1 %v1695_v44  ;;  %v1791_v43 = vld [vmem:[#allocation4 + $0x29c] ss:$36 sps:$4 sm:$0xff]   ;;  %v1794_v44 = vld [vmem:[#allocation4 + $0x2a4] ss:$36 sps:$4 sm:$0xff]  }
  0x52   :  { %885 = vmatprep.subr.bf16.mxu0 %v1696_v45  ;;  %928 = vmatprep.subr.bf16.mxu1 %v1698_v46  ;;  %v1789_v45 = vld [vmem:[#allocation4 + $0x298] ss:$36 sps:$4 sm:$0xff]   ;;  %v1792_v46 = vld [vmem:[#allocation4 + $0x2a0] ss:$36 sps:$4 sm:$0xff]  }
  0x55   :  { %886 = vmatpush2.bf16.msra.mxu0 %v1700_v47  ;;  %929 = vmatpush2.bf16.msra.mxu1 %v1701_v48  ;;  %v1797_v47 = vld [vmem:[#allocation4 + $0x254] ss:$36 sps:$4 sm:$0xff]   ;;  %v1800_v48 = vld [vmem:[#allocation4 + $0x25c] ss:$36 sps:$4 sm:$0xff]  }
  0x56   :  { %887 = vmatprep.subr.bf16.mxu0 %v1702_v49  ;;  %930 = vmatprep.subr.bf16.mxu1 %v1704_v50  ;;  %v1795_v49 = vld [vmem:[#allocation4 + $0x250] ss:$36 sps:$4 sm:$0xff]   ;;  %v1798_v50 = vld [vmem:[#allocation4 + $0x258] ss:$36 sps:$4 sm:$0xff]  }
  0x59   :  { %888 = vmatpush2.bf16.msra.mxu0 %v1706_v51  ;;  %931 = vmatpush2.bf16.msra.mxu1 %v1707_v52  ;;  %v1090_v51 = vld [vmem:[%s2072_s4 + $0x50] sm:$0x1]  ;;  %v1801_v52 = vld [vmem:[#allocation4 + $0x218] ss:$36 sps:$4 sm:$0xff]  }
  0x5a   :  { %889 = vmatprep.subr.bf16.mxu0 %v1708_v53  ;;  %932 = vmatprep.subr.bf16.mxu1 %v1710_v54  ;;  %v1890_v53 = vmov 0   ;;  %v1089_v54 = vld [vmem:[%s2072_s4 + $0x48] sm:$0x1] }
  0x5d   :  { %890 = vmatpush2.bf16.msra.mxu0 %v1712_v55  ;;  %933 = vmatpush2.bf16.msra.mxu1 %v1713_v56  ;;  %v1087_v55 = vld [vmem:[%s2072_s4 + $0x38] sm:$0xff]  ;;  %v1086_v56 = vld [vmem:[%s2072_s4 + $0x30] sm:$0xff] }
  0x5e   :  { %945 = vmatprep.subr.bf16.mxu0 %v1719_v57  ;;  %988 = vmatprep.subr.bf16.mxu1 %v1722_v58  ;;  %v1084_v57 = vld [vmem:[%s2072_s4 + $0x20] sm:$0xff] }
  0x5f   :  { %v1802_v58 = vld [vmem:[#allocation4 + $0x1d0] ss:$36 sps:$4 sm:$0xff]  }
  0x60   :  { %892 = vmatmul.mubr.bf16.vlgmr.msra.gmra.mxu0 %v1937_v59  ;;  %935 = vmatmul.mubr.bf16.vlgmr.msra.gmra.mxu1 %v1937_v59 }
  0x61   :  { %946 = vmatpush1.bf16.msra.mxu0 %v1717_v60  ;;  %989 = vmatpush1.bf16.msra.mxu1 %v1720_v61  ;;  %v1083_v60 = vld [vmem:[%s2072_s4 + $0x18] sm:$0xff]  ;;  %v1081_v61 = vld [vmem:[%s2072_s4 + $0x8] sm:$0xff] }
  0x62   :  { %947 = vmatprep.subr.bf16.mxu0 %v1725_v62  ;;  %990 = vmatprep.subr.bf16.mxu1 %v1728_v63  ;;  %v1891_v62 = vmov 0.0   ;;  %v1080_v63 = vld [vmem:[%s2072_s4] sm:$0xff] }
  0x63   :  { %1565 = vmatprep.mubr.msk.bf16.mxu0 %vm855_vm0, %v1931_v42  ;;  %1566 = vmatprep.mubr.msk.bf16.mxu1 %vm855_vm0, %v1931_v42 }
  0x65   :  { %948 = vmatpush1.bf16.msra.mxu0 %v1723_v0  ;;  %991 = vmatpush1.bf16.msra.mxu1 %v1726_v1  ;;  %v1072_v0 = vld [vmem:[%s2069_s1] sm:$0xff]  ;;  %v1803_v1 = vld [vmem:[#allocation4 + $0x188] ss:$36 sps:$4 sm:$0xff]  }
  0x66   :  { %949 = vmatprep.subr.bf16.mxu0 %v1731_v2  ;;  %992 = vmatprep.subr.bf16.mxu1 %v1734_v3  ;;  %v1091_v2 = vld [vmem:[%s2072_s4 + $0x58] sm:$0x1]  ;;  %v1073_v3 = vld [vmem:[%s2069_s1 + $0x8] sm:$0xff] }
  0x69   :  { %950 = vmatpush1.bf16.msra.mxu0 %v1729_v4  ;;  %993 = vmatpush1.bf16.msra.mxu1 %v1732_v5  ;;  %v1804_v4 = vld [vmem:[#allocation4 + $0x140] ss:$36 sps:$4 sm:$0xff]   ;;  %v1085_v5 = vld [vmem:[%s2072_s4 + $0x28] sm:$0xff] }
  0x6a   :  { %951 = vmatprep.subr.bf16.mxu0 %v1737_v6  ;;  %994 = vmatprep.subr.bf16.mxu1 %v1740_v7  ;;  %v1074_v6 = vld [vmem:[%s2069_s1 + $0x10] sm:$0xff]  ;;  %v1805_v7 = vld [vmem:[#allocation4 + $0xf8] ss:$36 sps:$4 sm:$0xff]  }
  0x6d   :  { %952 = vmatpush1.bf16.msra.mxu0 %v1735_v8  ;;  %995 = vmatpush1.bf16.msra.mxu1 %v1738_v9  ;;  %v1082_v8 = vld [vmem:[%s2072_s4 + $0x10] sm:$0xff]  ;;  %v1075_v9 = vld [vmem:[%s2069_s1 + $0x18] sm:$0xff] }
  0x6e   :  { %953 = vmatprep.subr.bf16.mxu0 %v1743_v10  ;;  %996 = vmatprep.subr.bf16.mxu1 %v1746_v11  ;;  %v1806_v10 = vld [vmem:[#allocation4 + $0xb0] ss:$36 sps:$4 sm:$0xff]  }
  0x6f   :  { %v1076_v11 = vld [vmem:[%s2069_s1 + $0x20] sm:$0xff] }
  0x71   :  { %954 = vmatpush1.bf16.msra.mxu0 %v1741_v12  ;;  %997 = vmatpush1.bf16.msra.mxu1 %v1744_v13  ;;  %v1807_v12 = vld [vmem:[#allocation4 + $0x68] ss:$36 sps:$4 sm:$0xff]   ;;  %v1077_v13 = vld [vmem:[%s2069_s1 + $0x28] sm:$0xff] }
  0x72   :  { %955 = vmatprep.subr.bf16.mxu0 %v1749_v14  ;;  %998 = vmatprep.subr.bf16.mxu1 %v1752_v15  ;;  %v1808_v14 = vld [vmem:[#allocation4 + $0x20] ss:$36 sps:$4 sm:$0xff]  }
  0x73   :  { %v1078_v15 = vld [vmem:[%s2069_s1 + $0x30] sm:$0xff] }
  0x75   :  { %956 = vmatpush1.bf16.msra.mxu0 %v1747_v16  ;;  %999 = vmatpush1.bf16.msra.mxu1 %v1750_v17  ;;  %v1809_v16 = vld [vmem:[#allocation4 + $0x3c8] ss:$36 sps:$4 sm:$0xff]  }
  0x76   :  { %957 = vmatprep.subr.bf16.mxu0 %v1755_v18  ;;  %1000 = vmatprep.subr.bf16.mxu1 %v1758_v19  ;;  %v1079_v17 = vld [vmem:[%s2069_s1 + $0x38] sm:$0xff]  ;;  %v1810_v18 = vld [vmem:[#allocation4 + $0x380] ss:$36 sps:$4 sm:$0xff]   ;;  %v1811_v19 = vld [vmem:[#allocation4 + $0x338] ss:$36 sps:$4 sm:$0xff]  }
  0x79   :  { %958 = vmatpush1.bf16.msra.mxu0 %v1753_v20  ;;  %1001 = vmatpush1.bf16.msra.mxu1 %v1756_v21  ;;  %v1812_v20 = vld [vmem:[#allocation4 + $0x2f0] ss:$36 sps:$4 sm:$0xff]   ;;  %v1813_v21 = vld [vmem:[#allocation4 + $0x2a8] ss:$36 sps:$4 sm:$0xff]  }
  0x7a   :  { %959 = vmatprep.subr.bf16.mxu0 %v1761_v22  ;;  %1002 = vmatprep.subr.bf16.mxu1 %v1764_v23  ;;  %v1814_v22 = vld [vmem:[#allocation4 + $0x260] ss:$36 sps:$4 sm:$0xff]  }
  0x7d   :  { %960 = vmatpush1.bf16.msra.mxu0 %v1759_v24  ;;  %1003 = vmatpush1.bf16.msra.mxu1 %v1762_v25 }
  0x7e   :  { %965 = vmatprep.subr.bf16.mxu0 %v1767_v26  ;;  %1008 = vmatprep.subr.bf16.mxu1 %v1770_v27 }
  0x81   :  { %966 = vmatpush2.bf16.msra.mxu0 %v1765_v28  ;;  %1009 = vmatpush2.bf16.msra.mxu1 %v1768_v29 }
  0x82   :  { %967 = vmatprep.subr.bf16.mxu0 %v1773_v30  ;;  %1010 = vmatprep.subr.bf16.mxu1 %v1776_v31 }
  0x85   :  { %968 = vmatpush2.bf16.msra.mxu0 %v1771_v32  ;;  %1011 = vmatpush2.bf16.msra.mxu1 %v1774_v33 }
  0x86   :  { %969 = vmatprep.subr.bf16.mxu0 %v1779_v34  ;;  %1012 = vmatprep.subr.bf16.mxu1 %v1782_v35  ;;  %v1345_v35 = vld [vmem:[#allocation6] sm:$0x77] }
  0x89   :  { %970 = vmatpush2.bf16.msra.mxu0 %v1777_v36  ;;  %1013 = vmatpush2.bf16.msra.mxu1 %v1780_v37  ;;  %v2048_v36 = vld [vmem:[#allocation6 + $0x8] sm:$0x77] }
  0x8a   :  { %971 = vmatprep.subr.bf16.mxu0 %v1785_v38  ;;  %1014 = vmatprep.subr.bf16.mxu1 %v1788_v39  ;;  %v1354_v39 = vcombine.high %v1345_v35, %v1345_v35 }
  0x8d   :  { %972 = vmatpush2.bf16.msra.mxu0 %v1783_v40  ;;  %1015 = vmatpush2.bf16.msra.mxu1 %v1786_v41  ;;  %v1355_v40 = vcombine.high %v2048_v36, %v2048_v36 }
  0x8e   :  { %973 = vmatprep.subr.bf16.mxu0 %v1791_v43  ;;  %1016 = vmatprep.subr.bf16.mxu1 %v1794_v44  ;;  %v1348_v43 = vld [vmem:[#allocation6 + $0x18] sm:$0x77] }
  0x91   :  { %974 = vmatpush2.bf16.msra.mxu0 %v1789_v45  ;;  %1017 = vmatpush2.bf16.msra.mxu1 %v1792_v46 }
  0x92   :  { %975 = vmatprep.subr.bf16.mxu0 %v1797_v47  ;;  %1018 = vmatprep.subr.bf16.mxu1 %v1800_v48  ;;  %v1347_v47 = vld [vmem:[#allocation6 + $0x10] sm:$0x77] }
  0x95   :  { %976 = vmatpush2.bf16.msra.mxu0 %v1795_v49  ;;  %1019 = vmatpush2.bf16.msra.mxu1 %v1798_v50 }
  0x96   :  { %1031 = vmatprep.subr.bf16.mxu0 %v1890_v53  ;;  %1568 = vmatprep.subr.msk.mxu1 %vm1117_vm1, %v1090_v51  ;;  %v1357_v51 = vcombine.high %v1348_v43, %v1348_v43 }
  0x98   :  { %978 = vmatmul.mubr.bf16.vlgmr.msra.gmra.mxu0 %v1937_v59  ;;  %1021 = vmatmul.mubr.bf16.vlgmr.msra.gmra.mxu1 %v1937_v59 }
  0x99   :  { %1032 = vmatpush1.bf16.msra.mxu0 %v1801_v52  ;;  %1569 = vmatpush1.msk.msra.mxu1 %vm1117_vm1, %v1089_v54 }
  0x9a   :  { %1153 = vmatprep.subr.mxu1 %v1087_v55  ;;  %1033 = vmatprep.subr.bf16.mxu0 %v1890_v53 }
  0x9b   :  { %1154 = vmatpush1.msra.mxu1 %v1086_v56  ;;  %1191 = vmatprep.mubr.f32.mxu1 %v1891_v62 }
  0x9c   :  { %1155 = vmatprep.subr.mxu1 %v1084_v57  ;;  %1567 = vmatprep.mubr.msk.bf16.mxu0 %vm855_vm0, %v1931_v42  ;;  %v1088_v42 = vld [vmem:[%s2072_s4 + $0x40] sm:$0xff] }
  0x9d   :  { %1034 = vmatpush1.bf16.msra.mxu0 %v1802_v58  ;;  %1156 = vmatpush1.msra.mxu1 %v1083_v60 }
  0x9e   :  { %1157 = vmatprep.subr.mxu1 %v1081_v61  ;;  %1035 = vmatprep.subr.bf16.mxu0 %v1890_v53 }
  0x9f   :  { %1158 = vmatpush1.msra.mxu1 %v1080_v63 }
  0xa0   :  { %1570 = vmatmul.mubr.msk.f32.vlgmr.msra.gmra.mxu1 %vm1092_vm2, %v1072_v0  ;;  %1601 = vmatprep.subr.msk.mxu1 %vm1117_vm1, %v1091_v2 }
  0xa1   :  { %1036 = vmatpush1.bf16.msra.mxu0 %v1803_v1  ;;  %1197 = vmatprep.mubr.f32.mxu1 %v1891_v62 }
  0xa2   :  { %1037 = vmatprep.subr.bf16.mxu0 %v1890_v53  ;;  %1602 = vmatpush3.msk.msra.mxu1 %vm1117_vm1, %v1091_v2 }
  0xa3   :  { %1603 = vmatprep.subr.mxu1 %v1088_v42 }
  0xa4   :  { %1571 = vmatmul.mubr.msk.f32.gmra.mxu1 %vm1092_vm2, %v1073_v3 }
  0xa5   :  { %1038 = vmatpush1.bf16.msra.mxu0 %v1804_v4  ;;  %1203 = vmatprep.mubr.f32.mxu1 %v1891_v62 }
  0xa6   :  { %1039 = vmatprep.subr.bf16.mxu0 %v1890_v53  ;;  %1604 = vmatpush3.msra.mxu1 %v1088_v42 }
  0xa7   :  { %1605 = vmatprep.subr.mxu1 %v1085_v5 }
  0xa8   :  { %1572 = vmatmul.mubr.msk.f32.gmra.mxu1 %vm1092_vm2, %v1074_v6 }
  0xa9   :  { %1040 = vmatpush1.bf16.msra.mxu0 %v1805_v7  ;;  %1209 = vmatprep.mubr.f32.mxu1 %v1891_v62 }
  0xaa   :  { %1041 = vmatprep.subr.bf16.mxu0 %v1890_v53  ;;  %1606 = vmatpush3.msra.mxu1 %v1085_v5 }
  0xab   :  { %1607 = vmatprep.subr.mxu1 %v1082_v8 }
  0xac   :  { %1573 = vmatmul.mubr.msk.f32.gmra.mxu1 %vm1092_vm2, %v1075_v9 }
  0xad   :  { %1042 = vmatpush1.bf16.msra.mxu0 %v1806_v10  ;;  %1215 = vmatprep.mubr.f32.mxu1 %v1891_v62 }
  0xae   :  { %1043 = vmatprep.subr.bf16.mxu0 %v1890_v53  ;;  %1608 = vmatpush3.msra.mxu1 %v1082_v8 }
  0xb0   :  { %1574 = vmatmul.mubr.msk.f32.gmra.mxu1 %vm1092_vm2, %v1076_v11 }
  0xb1   :  { %1044 = vmatpush1.bf16.msra.mxu0 %v1807_v12  ;;  %1221 = vmatprep.mubr.f32.mxu1 %v1891_v62 }
  0xb2   :  { %1045 = vmatprep.subr.bf16.mxu0 %v1890_v53 }
  0xb4   :  { %1575 = vmatmul.mubr.msk.f32.gmra.mxu1 %vm1092_vm2, %v1077_v13 }
  0xb5   :  { %1046 = vmatpush1.bf16.msra.mxu0 %v1808_v14  ;;  %1227 = vmatprep.mubr.f32.mxu1 %v1891_v62 }
  0xb6   :  { %1051 = vmatprep.subr.bf16.mxu0 %v1890_v53 }
  0xb8   :  { %1576 = vmatmul.mubr.msk.f32.gmra.mxu1 %vm1092_vm2, %v1078_v15 }
  0xb9   :  { %1052 = vmatpush2.bf16.msra.mxu0 %v1809_v16  ;;  %1233 = vmatprep.mubr.f32.mxu1 %v1891_v62 }
  0xba   :  { %1053 = vmatprep.subr.bf16.mxu0 %v1890_v53 }
  0xbc   :  { %1577 = vmatmul.mubr.msk.f32.gmra.mxu1 %vm1092_vm2, %v1079_v17 }
  0xbd   :  { %1054 = vmatpush2.bf16.msra.mxu0 %v1810_v18  ;;  %1609 = vmatprep.mubr.msk.f32.mxu1 %vm1092_vm2, %v1072_v0 }
  0xbe   :  { %1055 = vmatprep.subr.bf16.mxu0 %v1890_v53 }
  0xc0   :  { %1610 = vmatmul.mubr.msk.f32.vlgmr.msra.gmra.mxu1 %vm1092_vm2, %v1073_v3 }
  0xc1   :  { %1056 = vmatpush2.bf16.msra.mxu0 %v1811_v19  ;;  %1612 = vmatprep.mubr.msk.f32.mxu1 %vm1092_vm2, %v1074_v6 }
  0xc2   :  { %1057 = vmatprep.subr.bf16.mxu0 %v1890_v53 }
  0xc4   :  { %1613 = vmatmul.mubr.msk.f32.gmra.mxu1 %vm1092_vm2, %v1075_v9 }
  0xc5   :  { %1058 = vmatpush2.bf16.msra.mxu0 %v1812_v20  ;;  %1615 = vmatprep.mubr.msk.f32.mxu1 %vm1092_vm2, %v1076_v11 }
  0xc6   :  { %1059 = vmatprep.subr.bf16.mxu0 %v1890_v53 }
  0xc8   :  { %1616 = vmatmul.mubr.msk.f32.gmra.mxu1 %vm1092_vm2, %v1077_v13 }
  0xc9   :  { %1060 = vmatpush2.bf16.msra.mxu0 %v1813_v21  ;;  %1618 = vmatprep.mubr.msk.f32.mxu1 %vm1092_vm2, %v1078_v15 }
  0xca   :  { %1061 = vmatprep.subr.bf16.mxu0 %v1890_v53 }
  0xcc   :  { %1619 = vmatmul.mubr.msk.f32.gmra.mxu1 %vm1092_vm2, %v1079_v17 }
  0xcd   :  { %1062 = vmatpush2.bf16.msra.mxu0 %v1814_v22 }
  0xd0   :  { %1064 = vmatmul.mubr.bf16.vlgmr.msra.gmra.mxu0 %v1937_v59 }
 0x120   :  { %v2044_v23 = vpop.f32.mrf.mxu1  ;;  %v893_v29 = vpop.f32.mrf.mxu0 }
 0x121   :  { %v1362_v45 = vadd.f32 %v1345_v35, %v893_v29 }
 0x122   :  { %v938_v24 = vpop.f32.mrf.mxu1  ;;  %v895_v32 = vpop.f32.mrf.mxu0 }
 0x123   :  { %v1363_v49 = vadd.f32 %v1354_v39, %v895_v32  ;;  %v1365_v50 = vadd.f32 %v1355_v40, %v938_v24 }
 0x124   :  { %v2046_v25 = vpop.f32.mrf.mxu1  ;;  %v897_v37 = vpop.f32.mrf.mxu0 }
 0x125   :  { %v1395_v12 = vadd.f32 %v1345_v35, %v897_v37 }
 0x126   :  { %v942_v26 = vpop.f32.mrf.mxu1  ;;  %v899_v41 = vpop.f32.mrf.mxu0 }
 0x127   :  { %v1396_v15 = vadd.f32 %v1354_v39, %v899_v41  ;;  %v1398_v16 = vadd.f32 %v1355_v40, %v942_v26 }
 0x158   :  { %v1022_v27 = vpop.f32.mrf.mxu1  ;;  %v979_v46 = vpop.f32.mrf.mxu0 }
 0x159   :  { %v1366_v54 = vadd.f32 %v1347_v47, %v979_v46  ;;  %v1368_v58 = vadd.f32 %v1348_v43, %v1022_v27 }
 0x15a   :  { %v1024_v28 = vpop.f32.mrf.mxu1  ;;  %v981_v9 = vpop.f32.mrf.mxu0 }
 0x15b   :  { %v1369_v61 = vadd.f32 %v1357_v51, %v1024_v28 }
 0x15c   :  { %v1026_v30 = vpop.f32.mrf.mxu1  ;;  %v983_v13 = vpop.f32.mrf.mxu0 }
 0x15d   :  { %v1399_v19 = vadd.f32 %v1347_v47, %v983_v13  ;;  %v1401_v24 = vadd.f32 %v1348_v43, %v1026_v30  ;;  %v1356_v43 = vcombine.high %v1347_v47, %v1347_v47 }
 0x15e   :  { %v1028_v31 = vpop.f32.mrf.mxu1 }
 0x15f   :  { %v1402_v28 = vadd.f32 %v1357_v51, %v1028_v31  ;;  %v1364_v31 = vadd.f32 %v2048_v36, %v2044_v23  ;;  %v1367_v51 = vadd.f32 %v1356_v43, %v981_v9 }
 0x160   :  { %v1193_v33 = vpop.f32.mrf.mxu1 }
 0x161   :  { %v1371_v52 = vmul.f32 %v1362_v45, %v1193_v33 }
 0x162   :  { %v1195_v34 = vpop.f32.mrf.mxu1 }
 0x163   :  { %v1372_v55 = vmul.f32 %v1363_v49, %v1195_v34  ;;  %v985_v49 = vpop.f32.mrf.mxu0 }
 0x164   :  { %v1199_v38 = vpop.f32.mrf.mxu1 }
 0x165   :  { %v1377_v56 = vmul.f32 %v1365_v50, %v1199_v38  ;;  %v1349_v50 = vld [vmem:[#allocation6 + $0x20] sm:$0x7] }
 0x166   :  { %v1201_v59 = vpop.f32.mrf.mxu1 }
 0x167   :  { %v1378_v62 = vmul.f32 %v1366_v54, %v1201_v59 }
 0x168   :  { %v1205_v44 = vpop.f32.mrf.mxu1 }
 0x169   :  { %v1383_v2 = vmul.f32 %v1368_v58, %v1205_v44 }
 0x16a   :  { %v1207_v48 = vpop.f32.mrf.mxu1 }
 0x16b   :  { %v1384_v42 = vmul.f32 %v1369_v61, %v1207_v48  ;;  %v1397_v48 = vadd.f32 %v2048_v36, %v2046_v25 }
 0x16c   :  { %v1211_v53 = vpop.f32.mrf.mxu1 }
 0x16d   :  { %v1374_v57 = vadd.f32 %v1371_v52, %v1211_v53 }
 0x16e   :  { %v1213_v60 = vpop.f32.mrf.mxu1 }
 0x16f   :  { %v1380_v63 = vadd.f32 %v1377_v56, %v1374_v57  ;;  %v1375_v0 = vadd.f32 %v1372_v55, %v1213_v60  ;;  %v1400_v60 = vadd.f32 %v1356_v43, %v985_v49 }
 0x170   :  { %v1217_v1 = vpop.f32.mrf.mxu1 }
 0x171   :  { %v1381_v3 = vadd.f32 %v1378_v62, %v1375_v0  ;;  %v1386_v5 = vadd.f32 %v1383_v2, %v1380_v63  ;;  %v1404_v17 = vmul.f32 %v1395_v12, %v1217_v1 }
 0x172   :  { %v1219_v4 = vpop.f32.mrf.mxu1 }
 0x173   :  { %v1387_v6 = vadd.f32 %v1384_v42, %v1381_v3  ;;  %v1405_v20 = vmul.f32 %v1396_v15, %v1219_v4 }
 0x174   :  { %v1223_v7 = vpop.f32.mrf.mxu1 }
 0x175   :  { %v1391_v8 = vcombine.low %v1386_v5, %v1387_v6  ;;  %v1410_v21 = vmul.f32 %v1398_v16, %v1223_v7 }
 0x176   :  { %v1225_v10 = vpop.f32.mrf.mxu1 }
 0x177   :  { %1393 = vst [vmem:[%s2073_s5] sm:$0x77] %v1391_v8  ;;  %v1411_v29 = vmul.f32 %v1399_v19, %v1225_v10 }
 0x178   :  { %v1229_v11 = vpop.f32.mrf.mxu1 }
 0x179   :  { %v1416_v38 = vmul.f32 %v1401_v24, %v1229_v11 }
 0x17a   :  { %v1231_v14 = vpop.f32.mrf.mxu1 }
 0x17b   :  { %v1417_v59 = vmul.f32 %v1402_v28, %v1231_v14 }
 0x17c   :  { %v1235_v18 = vpop.f32.mrf.mxu1 }
 0x17d   :  { %v1407_v22 = vadd.f32 %v1404_v17, %v1235_v18 }
 0x17e   :  { %v1237_v27 = vpop.f32.mrf.mxu1 }
 0x17f   :  { %v1413_v32 = vadd.f32 %v1410_v21, %v1407_v22  ;;  %v1408_v33 = vadd.f32 %v1405_v20, %v1237_v27 }
 0x180   :  { %v1611_v34 = vpop.f32.mrf.mxu1 }
 0x181   :  { %v1414_v35 = vadd.f32 %v1411_v29, %v1408_v33  ;;  %v1419_v44 = vadd.f32 %v1416_v38, %v1413_v32  ;;  %v1379_v56 = vmul.f32 %v1611_v34, %v1367_v51 }
 0x182   :  { %v1306_v37 = vpop.f32.mrf.mxu1 }
 0x183   :  { %v1420_v39 = vadd.f32 %v1417_v59, %v1414_v35  ;;  %v1373_v45 = vmul.f32 %v1364_v31, %v1306_v37 }
 0x184   :  { %v1614_v26 = vpop.f32.mrf.mxu1 }
 0x185   :  { %v1424_v40 = vcombine.low %v1419_v44, %v1420_v39  ;;  %v1376_v52 = vadd.f32 %v1614_v26, %v1373_v45 }
 0x186   :  { %v1316_v41 = vpop.f32.mrf.mxu1 }
 0x187   :  { %1587 = vst [vmem:[%s2073_s5 + $0xc] sm:$0x77] %v1424_v40  ;;  %v1382_v61 = vadd.f32 %v1379_v56, %v1376_v52 }
 0x188   :  { %v1617_v30 = vpop.f32.mrf.mxu1 }
 0x189   :  { %v1412_v63 = vmul.f32 %v1617_v30, %v1400_v60 }
 0x18a   :  { %v1326_v46 = vpop.f32.mrf.mxu1 }
 0x18b   :  { %v1406_v53 = vmul.f32 %v1397_v48, %v1326_v46 }
 0x18c   :  { %v1620_v54 = vpop.f32.mrf.mxu1 }
 0x18d   :  { %v1409_v62 = vadd.f32 %v1620_v54, %v1406_v53 }
 0x18e   :  { %v1336_v2 = vpop.f32.mrf.mxu1 }
 0x18f   :  { %v1415_v36 = vadd.f32 %v1412_v63, %v1409_v62 }
 0x190   :  { %v1065_v55 = vpop.f32.mrf.mxu0 }
 0x191   :  { %v1370_v57 = vadd.f32 %v1349_v50, %v1065_v55 }
 0x192   :  { %v1067_v58 = vpop.f32.mrf.mxu0 }
 0x193   :  { %v1385_v23 = vmul.f32 %v1370_v57, %v1316_v41 }
 0x194   :  { %v1068_v47 = vpop.f32.mrf.mxu0 }
 0x195   :  { %v1388_v0 = vadd.f32 %v1385_v23, %v1382_v61  ;;  %v1403_v1 = vadd.f32 %v1349_v50, %v1068_v47 }
 0x196   :  { %v1070_v25 = vpop.f32.mrf.mxu0 }
 0x197   :  { %1394 = vst [vmem:[%s2073_s5 + $0x8] sm:$0x7] %v1388_v0  ;;  %v1418_v42 = vmul.f32 %v1403_v1, %v1336_v2 }
 0x199   :  { %v1421_v3 = vadd.f32 %v1418_v42, %v1415_v36 }
 0x19b   :  { %1588 = vst [vmem:[%s2073_s5 + $0x14] sm:$0x7] %v1421_v3 }
 0x19c   :  { %1433 = vsyncpa [#allocation3], 1 }
 0x19d   :  { %1434 = vsyncpa [#allocation5], 1 }

</bundles_post_ra>
